<compile_context>
chip_gen: v7x
topology: tpu7x:2x2x1
jax: 0.10.0
libtpu: 0.0.40
codegen_flags: <defaults>
</compile_context>

<pallas_src>
import jax
import jax.numpy as jnp
from jax.experimental import pallas as pl
from jax.experimental.pallas import tpu as pltpu

_LANES = 128


def _round_up(v, m):
    return ((v + m - 1) // m) * m


# ---------------------------------------------------------------------------
# Kernels
# ---------------------------------------------------------------------------
def _predictor_kernel(x_ref, w_ref, b_ref, out_ref):
    """Whole contraction dim resident: one fused matmul + f32 bias add."""
    acc = jnp.dot(x_ref[...], w_ref[...], preferred_element_type=jnp.float32)
    out_ref[...] = (acc + b_ref[...]).astype(out_ref.dtype)


def _predictor_kernel_ktiled(x_ref, w_ref, b_ref, out_ref, acc_ref):
    """Contraction dim tiled: f32 VMEM accumulator, finalize on last K step."""
    k = pl.program_id(1)

    @pl.when(k == 0)
    def _():
        acc_ref[...] = jnp.zeros_like(acc_ref)

    acc_ref[...] += jnp.dot(x_ref[...], w_ref[...],
                            preferred_element_type=jnp.float32)

    @pl.when(k == pl.num_programs(1) - 1)
    def _():
        out_ref[...] = (acc_ref[...] + b_ref[...]).astype(out_ref.dtype)


# ---------------------------------------------------------------------------
# One-time parameter fusion (hoisted out of the per-call path)
# ---------------------------------------------------------------------------
def fuse_fast_rcnn_params(w_cls, b_cls, w_bbox, b_bbox, *,
                          compute_dtype=None,
                          max_resident_weight_bytes=4 * 1024 * 1024):
    """Build the fused, lane-padded weight/bias ONCE per model.

    w_cls:  (C, num_classes)        b_cls:  (num_classes,)
    w_bbox: (C, 4 * num_classes)    b_bbox: (4 * num_classes,)
    Returns a dict consumed by `fast_rcnn_predictor_fused`.
    """
    c, nc = w_cls.shape
    c2, nb = w_bbox.shape
    assert c == c2, "both heads must share in_channels"

    w_dtype = compute_dtype if compute_dtype is not None else w_cls.dtype
    nc_pad = _round_up(nc, _LANES)
    nb_pad = _round_up(nb, _LANES)
    out_p = nc_pad + nb_pad

    # Each head starts on its own 128-lane boundary; padded columns are zero,
    # so the post-kernel slices are exact AND lane-aligned.
    w = jnp.zeros((c, out_p), w_dtype)
    w = w.at[:, :nc].set(w_cls.astype(w_dtype))
    w = w.at[:, nc_pad:nc_pad + nb].set(w_bbox.astype(w_dtype))

    # Bias stays f32: added directly onto the f32 accumulator in-kernel.
    b = jnp.zeros((1, out_p), jnp.float32)
    b = b.at[0, :nc].set(b_cls.astype(jnp.float32))
    b = b.at[0, nc_pad:nc_pad + nb].set(b_bbox.astype(jnp.float32))

    # Very large C: tile the contraction axis instead of keeping W resident.
    tile_k = None
    c_pad = c
    if c * out_p * jnp.dtype(w_dtype).itemsize > max_resident_weight_bytes:
        c_pad = _round_up(c, _LANES)
        if c_pad != c:
            w = jnp.pad(w, ((0, c_pad - c), (0, 0)))  # zero rows: no effect on dot
        tile_k = next(t for t in (512, 256, 128) if c_pad % t == 0)

    return dict(w=w, b=b, c=c, c_pad=c_pad, nc=nc, nb=nb, nc_pad=nc_pad,
                out_p=out_p, tile_k=tile_k)


# ---------------------------------------------------------------------------
# Forward pass (pre-fused parameters)
# ---------------------------------------------------------------------------
def fast_rcnn_predictor_fused(x, fused, *, tile_n=512, compute_dtype=None,
                              single_buffer_weights=True, x_buffers=2):
    """FastRCNNPredictor.forward using pre-fused params from
    `fuse_fast_rcnn_params`. Returns (scores, bbox_deltas)."""
    if x.ndim == 4:
        assert x.shape[2] == 1 and x.shape[3] == 1, "expected [N, C, 1, 1]"
    x2d = x.reshape(x.shape[0], -1)                     # flatten(start_dim=1)
    if compute_dtype is not None and x2d.dtype != compute_dtype:
        x2d = x2d.astype(compute_dtype)                 # e.g. bf16 on v5e/v6e

    n, c = x2d.shape
    w, b = fused["w"], fused["b"]
    assert c == fused["c"], "in_channels mismatch with fused params"
    c_pad, out_p = fused["c_pad"], fused["out_p"]
    nc, nb, nc_pad = fused["nc"], fused["nb"], fused["nc_pad"]
    tile_k = fused["tile_k"]
    out_dtype = x2d.dtype

    # ---- ROI (N) tiling ---------------------------------------------------
    # Big tiles amortize the ~0.35us/step grid overhead; an even step count
    # (>=2) keeps both v7x TensorCores busy (negligible cost on 1-TC chips).
    sublane = max(8, 32 // jnp.dtype(x2d.dtype).itemsize)  # f32:8 bf16:16 i8/fp8:32
    n_min = _round_up(n, sublane)
    if n_min >= 512:
        steps = max(2, pl.cdiv(n_min, tile_n))
        steps += steps % 2
        tn = _round_up(pl.cdiv(n_min, steps), sublane)
    else:
        tn = n_min
    n_pad = _round_up(n, tn)
    grid_n = n_pad // tn

    pad_rows, pad_cols = n_pad - n, c_pad - c
    if pad_rows or pad_cols:
        x2d = jnp.pad(x2d, ((0, pad_rows), (0, pad_cols)))

    # ---- cost estimate / VMEM budget ---------------------------------------
    x_item = jnp.dtype(x2d.dtype).itemsize
    w_item = jnp.dtype(w.dtype).itemsize
    o_item = jnp.dtype(out_dtype).itemsize
    k_blk = tile_k if tile_k is not None else c_pad
    vmem_need = (2 * tn * k_blk * x_item            # x tiles (double-buffered)
                 + 2 * k_blk * out_p * w_item       # fused W block(s)
                 + 2 * out_p * 4                    # bias
                 + 2 * tn * out_p * o_item          # out tiles
                 + (tn * out_p * 4 if tile_k is not None else 0))  # f32 acc
    vmem_limit = int(min(128 << 20, max(32 << 20, 2 * vmem_need)))
    cost = pl.CostEstimate(
        flops=2 * n_pad * c_pad * out_p,
        transcendentals=0,
        bytes_accessed=(x2d.size * x_item + w.size * w_item + b.size * 4
                        + n_pad * out_p * o_item),
    )

    def _run(use_pipeline_modes):
        res_mode = ({"pipeline_mode": pl.Buffered(1)}
                    if (use_pipeline_modes and single_buffer_weights) else {})
        x_mode = ({"pipeline_mode": pl.Buffered(x_buffers)}
                  if (use_pipeline_modes and x_buffers != 2) else {})

        if tile_k is None:
            grid = (grid_n,)
            kernel = _predictor_kernel
            in_specs = [
                pl.BlockSpec((tn, c_pad), lambda i: (i, 0), **x_mode),
                pl.BlockSpec((c_pad, out_p), lambda i: (0, 0), **res_mode),
                pl.BlockSpec((1, out_p), lambda i: (0, 0), **res_mode),
            ]
            out_specs = pl.BlockSpec((tn, out_p), lambda i: (i, 0))
            scratch = ()
            dim_sem = ("parallel",)
        else:
            grid = (grid_n, c_pad // tile_k)
            kernel = _predictor_kernel_ktiled
            in_specs = [
                pl.BlockSpec((tn, tile_k), lambda i, k: (i, k), **x_mode),
                pl.BlockSpec((tile_k, out_p), lambda i, k: (k, 0)),
                pl.BlockSpec((1, out_p), lambda i, k: (0, 0), **res_mode),
            ]
            out_specs = pl.BlockSpec((tn, out_p), lambda i, k: (i, 0))
            scratch = (pltpu.VMEM((tn, out_p), jnp.float32),)
            dim_sem = ("parallel", "arbitrary")

        return pl.pallas_call(
            kernel,
            out_shape=jax.ShapeDtypeStruct((n_pad, out_p), out_dtype),
            grid_spec=pltpu.PrefetchScalarGridSpec(
                num_scalar_prefetch=0,
                grid=grid,
                in_specs=in_specs,
                out_specs=out_specs,
                scratch_shapes=scratch,
            ),
            compiler_params=pltpu.CompilerParams(
                dimension_semantics=dim_sem,
                vmem_limit_bytes=vmem_limit,
            ),
            cost_estimate=cost,
        )(x2d, w, b)

    try:
        out = _run(True)
    except Exception:
        # pipeline_mode / pl.Buffered may be unsupported on older JAX; fall
        # back to default double-buffering (correctness unaffected).
        out = _run(False)

    # Padded rows / padded head columns are exact zeros; slices start at
    # lane-aligned columns (0 and nc_pad).
    scores = out[:n, :nc]
    bbox_deltas = out[:n, nc_pad:nc_pad + nb]
    return scores, bbox_deltas


def fast_rcnn_predictor(x, w_cls, b_cls, w_bbox, b_bbox, *,
                        compute_dtype=None, **kwargs):
    """Drop-in wrapper with the original (unfused) parameter signature.

    NOTE: this re-builds the fused weight on every call; for production,
    fuse once with `fuse_fast_rcnn_params` and call
    `fast_rcnn_predictor_fused` (removes the per-call C x out_p HBM copy).
    """
    fused = fuse_fast_rcnn_params(w_cls, b_cls, w_bbox, b_bbox,
                                  compute_dtype=compute_dtype)
    return fast_rcnn_predictor_fused(x, fused, compute_dtype=compute_dtype,
                                     **kwargs)


def init_params(key, in_channels, num_classes, dtype=jnp.float32):
    """Deterministic synthetic init mimicking nn.Linear's uniform init.
    Weights are stored already transposed: (in_channels, out_features)."""
    k1, k2, k3, k4 = jax.random.split(key, 4)
    bound = 1.0 / jnp.sqrt(in_channels)
    w_cls = jax.random.uniform(k1, (in_channels, num_classes), dtype, -bound, bound)
    b_cls = jax.random.uniform(k2, (num_classes,), dtype, -bound, bound)
    w_bbox = jax.random.uniform(k3, (in_channels, num_classes * 4), dtype, -bound, bound)
    b_bbox = jax.random.uniform(k4, (num_classes * 4,), dtype, -bound, bound)
    return w_cls, b_cls, w_bbox, b_bbox


if __name__ == "__main__":
    key = jax.random.PRNGKey(0)
    kx, kp, kx2, kp2 = jax.random.split(key, 4)

    # --- Case 1: tiny ROI-head shapes, 4-D input (N, C, 1, 1) --------------
    batch, in_channels, num_classes = 2, 32, 5
    x = jax.random.normal(kx, (batch, in_channels, 1, 1), jnp.float32)
    params = init_params(kp, in_channels, num_classes)
    fused = fuse_fast_rcnn_params(*params)          # hoisted: once per model
    scores, bbox = fast_rcnn_predictor_fused(x, fused)
    jax.block_until_ready((scores, bbox))

    w_cls, b_cls, w_bbox, b_bbox = params
    x2d = x.reshape(batch, -1)
    assert scores.shape == (batch, num_classes)
    assert bbox.shape == (batch, num_classes * 4)
    assert jnp.allclose(scores, x2d @ w_cls + b_cls, atol=1e-5, rtol=1e-5)
    assert jnp.allclose(bbox, x2d @ w_bbox + b_bbox, atol=1e-5, rtol=1e-5)

    # --- Case 2: larger N (multi-step even grid) + forced K-tiled path -----
    batch2, in_channels2, num_classes2 = 600, 384, 5
    x2 = jax.random.normal(kx2, (batch2, in_channels2), jnp.float32)
    params2 = init_params(kp2, in_channels2, num_classes2)
    w2c, b2c, w2b, b2b = params2

    fused_res = fuse_fast_rcnn_params(*params2)                    # resident W
    fused_kt = fuse_fast_rcnn_params(*params2,
                                     max_resident_weight_bytes=1)  # K-tiled
    s_res, d_res = fast_rcnn_predictor_fused(x2, fused_res)
    s_kt, d_kt = fast_rcnn_predictor_fused(x2, fused_kt)
    jax.block_until_ready((s_res, d_res, s_kt, d_kt))

    ref_s = x2 @ w2c + b2c
    ref_d = x2 @ w2b + b2b
    for s_out, d_out in ((s_res, d_res), (s_kt, d_kt)):
        assert s_out.shape == (batch2, num_classes2)
        assert d_out.shape == (batch2, num_classes2 * 4)
        assert jnp.allclose(s_out, ref_s, atol=1e-2, rtol=1e-2)
        assert jnp.allclose(d_out, ref_d, atol=1e-2, rtol=1e-2)
    # The two kernel paths must agree closely with each other (both f32 acc).
    assert jnp.allclose(s_res, s_kt, atol=1e-3, rtol=1e-3)
    assert jnp.allclose(d_res, d_kt, atol=1e-3, rtol=1e-3)

    print("KERNEL_OK")
</pallas_src>

<mosaic_0001>
module attributes {stable_mosaic.version = 11 : i64} {
  func.func @_predictor_kernel(%arg0: i32, %arg1: memref<8x32xf32, #tpu.memory_space<vmem>>, %arg2: memref<32x256xf32, #tpu.memory_space<vmem>>, %arg3: memref<1x256xf32, #tpu.memory_space<vmem>>, %arg4: memref<8x256xf32, #tpu.memory_space<vmem>>) attributes {dimension_semantics = [#tpu.dimension_semantics<parallel>], iteration_bounds = array<i64: 1>, scalar_prefetch = 0 : i64, scratch_operands = 0 : i64, tpu.core_type = #tpu.core_type<tc>, window_params = [{transform_indices = @transform_0, window_bounds = array<i64: 8, 32>}, {pipeline_mode = #tpu.pipeline_mode<synchronous>, transform_indices = @transform_1, window_bounds = array<i64: 32, 256>}, {pipeline_mode = #tpu.pipeline_mode<synchronous>, transform_indices = @transform_2, window_bounds = array<i64: 1, 256>}, {transform_indices = @transform_3, window_bounds = array<i64: 8, 256>}]} {
    %c0 = arith.constant 0 : index
    %c0_0 = arith.constant 0 : index
    %0 = vector.load %arg1[%c0, %c0_0] : memref<8x32xf32, #tpu.memory_space<vmem>>, vector<8x32xf32>
    %c0_1 = arith.constant 0 : index
    %c0_2 = arith.constant 0 : index
    %1 = vector.load %arg2[%c0_1, %c0_2] : memref<32x256xf32, #tpu.memory_space<vmem>>, vector<32x256xf32>
    %cst = arith.constant dense<0.000000e+00> : vector<8x256xf32>
    %2 = tpu.matmul %0, %1, %cst {dimension_numbers = #tpu.dot_dimension_numbers<[1], [0], [0], [1], [0, 0, 1, 1], [], []>} : vector<8x32xf32>, vector<32x256xf32>, vector<8x256xf32> -> vector<8x256xf32>
    %c0_3 = arith.constant 0 : index
    %c0_4 = arith.constant 0 : index
    %3 = vector.load %arg3[%c0_3, %c0_4] : memref<1x256xf32, #tpu.memory_space<vmem>>, vector<1x256xf32>
    %4 = vector.broadcast %3 : vector<1x256xf32> to vector<8x256xf32>
    %5 = arith.addf %2, %4 : vector<8x256xf32>
    %c0_5 = arith.constant 0 : index
    %c0_6 = arith.constant 0 : index
    %6 = vector.load %arg4[%c0_5, %c0_6] : memref<8x256xf32, #tpu.memory_space<vmem>>, vector<8x256xf32>
    tpu.vector_store %arg4[%c0_5, %c0_6], %5 {strides = array<i32>} : memref<8x256xf32, #tpu.memory_space<vmem>>, vector<8x256xf32>,
    return
  }
  func.func @transform_0(%arg0: i32) -> (i32, i32) {
    %c0_i32 = arith.constant 0 : i32
    %c0_i32_0 = arith.constant 0 : i32
    return %arg0, %c0_i32 : i32, i32
  }
  func.func @transform_1(%arg0: i32) -> (i32, i32) {
    %c0_i32 = arith.constant 0 : i32
    %c0_i32_0 = arith.constant 0 : i32
    %c0_i32_1 = arith.constant 0 : i32
    return %c0_i32, %c0_i32_0 : i32, i32
  }
  func.func @transform_2(%arg0: i32) -> (i32, i32) {
    %c0_i32 = arith.constant 0 : i32
    %c0_i32_0 = arith.constant 0 : i32
    %c0_i32_1 = arith.constant 0 : i32
    return %c0_i32, %c0_i32_0 : i32, i32
  }
  func.func @transform_3(%arg0: i32) -> (i32, i32) {
    %c0_i32 = arith.constant 0 : i32
    %c0_i32_0 = arith.constant 0 : i32
    return %arg0, %c0_i32 : i32, i32
  }
}

module attributes {stable_mosaic.version = 11 : i64} {
  func.func @_predictor_kernel(%arg0: i32, %arg1: memref<8x32xf32, #tpu.memory_space<vmem>>, %arg2: memref<32x256xf32, #tpu.memory_space<vmem>>, %arg3: memref<1x256xf32, #tpu.memory_space<vmem>>, %arg4: memref<8x256xf32, #tpu.memory_space<vmem>>) attributes {dimension_semantics = [#tpu.dimension_semantics<parallel>], iteration_bounds = array<i64: 1>, scalar_prefetch = 0 : i64, scratch_operands = 0 : i64, tpu.core_type = #tpu.core_type<tc>, window_params = [{transform_indices = @transform_0, window_bounds = array<i64: 8, 32>}, {pipeline_mode = #tpu.pipeline_mode<synchronous>, transform_indices = @transform_1, window_bounds = array<i64: 32, 256>}, {pipeline_mode = #tpu.pipeline_mode<synchronous>, transform_indices = @transform_2, window_bounds = array<i64: 1, 256>}, {transform_indices = @transform_3, window_bounds = array<i64: 8, 256>}]} {
    %c0 = arith.constant 0 : index
    %c0_0 = arith.constant 0 : index
    %0 = vector.load %arg1[%c0, %c0_0] : memref<8x32xf32, #tpu.memory_space<vmem>>, vector<8x32xf32>
    %c0_1 = arith.constant 0 : index
    %c0_2 = arith.constant 0 : index
    %1 = vector.load %arg2[%c0_1, %c0_2] : memref<32x256xf32, #tpu.memory_space<vmem>>, vector<32x256xf32>
    %cst = arith.constant dense<0.000000e+00> : vector<8x256xf32>
    %2 = tpu.matmul %0, %1, %cst {dimension_numbers = #tpu.dot_dimension_numbers<[1], [0], [0], [1], [0, 0, 1, 1], [], []>} : vector<8x32xf32>, vector<32x256xf32>, vector<8x256xf32> -> vector<8x256xf32>
    %c0_3 = arith.constant 0 : index
    %c0_4 = arith.constant 0 : index
    %3 = vector.load %arg3[%c0_3, %c0_4] : memref<1x256xf32, #tpu.memory_space<vmem>>, vector<1x256xf32>
    %4 = vector.broadcast %3 : vector<1x256xf32> to vector<8x256xf32>
    %5 = arith.addf %2, %4 : vector<8x256xf32>
    %c0_5 = arith.constant 0 : index
    %c0_6 = arith.constant 0 : index
    %6 = vector.load %arg4[%c0_5, %c0_6] : memref<8x256xf32, #tpu.memory_space<vmem>>, vector<8x256xf32>
    tpu.vector_store %arg4[%c0_5, %c0_6], %5 {strides = array<i32>} : memref<8x256xf32, #tpu.memory_space<vmem>>, vector<8x256xf32>,
    return
  }
  func.func @transform_0(%arg0: i32) -> (i32, i32) {
    %c0_i32 = arith.constant 0 : i32
    %c0_i32_0 = arith.constant 0 : i32
    return %arg0, %c0_i32 : i32, i32
  }
  func.func @transform_1(%arg0: i32) -> (i32, i32) {
    %c0_i32 = arith.constant 0 : i32
    %c0_i32_0 = arith.constant 0 : i32
    %c0_i32_1 = arith.constant 0 : i32
    return %c0_i32, %c0_i32_0 : i32, i32
  }
  func.func @transform_2(%arg0: i32) -> (i32, i32) {
    %c0_i32 = arith.constant 0 : i32
    %c0_i32_0 = arith.constant 0 : i32
    %c0_i32_1 = arith.constant 0 : i32
    return %c0_i32, %c0_i32_0 : i32, i32
  }
  func.func @transform_3(%arg0: i32) -> (i32, i32) {
    %c0_i32 = arith.constant 0 : i32
    %c0_i32_0 = arith.constant 0 : i32
    return %arg0, %c0_i32 : i32, i32
  }
}

</mosaic_0001>

<bundles_post_ra>
// kernel: tpu_custom_call.1
= control target key start
LH: loop header
LB: loop body
LE: loop exit
PB: predicated region body
PF: predicated region fallthrough
CT: control target
= control target key end

     0   :  { %8 = vsyncpa [#allocation3], 0  ;;  %s314_s0 = inlined_call_operand.hbm [shape: f32[8,32], index: 0, kind: input, shape index: {}]   ;;  %s315_s1 = inlined_call_operand.hbm [shape: f32[32,256], index: 1, kind: input, shape index: {}]   ;;  %s316_s2 = inlined_call_operand.vmem [shape: f32[1,256], index: 2, kind: input, shape index: {}]   ;;  %s317_s3 = inlined_call_operand.hbm [shape: f32[8,256], index: 3, kind: output, shape index: {}]  }
   0x1   :  { %9 = vsyncpa [#allocation6], 0 }
   0x2   :  { %10 = vsyncpa [#allocation4], 0  ;;  %s242_s12 = smov [#allocation2]   ;;  %s243_s14 = smov [#allocation5]  }
   0x3   :  { %s17_s13 = sshll.u32 %s242_s12, 4  ;;  %s26_s15 = sshll.u32 %s243_s14, 4  ;;  %s18_s13 = int_to_ptr.vmem [resolvable:$true] %s17_s13  ;;  %s268_s15 = int_to_ptr.vmem [resolvable:$true] %s26_s15 }
   0x4   :  { %s170_s18 = scalar_lea.hbm %s314_s0, 128 }
   0x5   :  { %p171_p0 = scmp.ne.s32.totalorder %s314_s0, %s170_s18  ;;  %p174_p1 = scmp.lt.u32.totalorder %s170_s18, %s314_s0 }
   0x7   :  { %p176_p2 = pnand %p174_p1, %p171_p0 }
   0x9   :  { %179 = shalt.err (!%p176_p2)
}
   0xa   :  { %s180_s23 = scalar_lea.vmem %s18_s13, 128  ;;  %p185_p4 = scmp.lt.s32.totalorder %s18_s13, %s18_s13 }
   0xb   :  { %p181_p3 = scmp.ne.s32.totalorder %s18_s13, %s180_s23  ;;  %p186_p5 = scmp.lt.s32.totalorder %s180_s23, %s180_s23 }
   0xd   :  { %p187_p6 = por %p186_p5, %p185_p4 }
   0xf   :  { %p188_p7 = pnand %p187_p6, %p181_p3 }
  0x11   :  { %191 = shalt.err (!%p188_p7)
}
  0x12   :  { %20 = dma.hbm_to_vmem [thread:$0]  %s314_s0, 128, %s18_s13, [#allocation3]  }
  0x13   :  { %s192_s28 = scalar_lea.hbm %s315_s1, 1024 }
  0x14   :  { %p193_p8 = scmp.ne.s32.totalorder %s315_s1, %s192_s28  ;;  %p196_p9 = scmp.lt.u32.totalorder %s192_s28, %s315_s1 }
  0x16   :  { %p198_p10 = pnand %p196_p9, %p193_p8 }
  0x18   :  { %201 = shalt.err (!%p198_p10)
}
  0x19   :  { %s202_s6 = scalar_lea.vmem %s268_s15, 1024  ;;  %p207_p12 = scmp.lt.s32.totalorder %s268_s15, %s268_s15 }
  0x1a   :  { %p203_p11 = scmp.ne.s32.totalorder %s268_s15, %s202_s6  ;;  %p208_p13 = scmp.lt.s32.totalorder %s202_s6, %s202_s6 }
  0x1c   :  { %p209_p0 = por %p208_p13, %p207_p12 }
  0x1e   :  { %p210_p1 = pnand %p209_p0, %p203_p11 }
  0x20   :  { %213 = shalt.err (!%p210_p1)
}
  0x21   :  { %s244_s0 = smov 256   ;;  %s245_s7 = smov 16  }
  0x22   :  { %32 = dma.hbm_to_vmem [thread:$0]  %s315_s1, 1024, %s268_s15, [#allocation6], %s244_s0, %s244_s0, %s245_s7  }
  0x23   :  { %236 = dma.done.wait [#allocation3], 128  }
  0x24   :  { %237 = vsyncadd [#allocation3], 4294967168 }
  0x25   :  { %238 = dma.done.wait [#allocation6], 1024  }
  0x26   :  { %239 = vsyncadd [#allocation6], 4294966272  ;;  %v246_v0 = vmov 0.0   ;;  %v43_v1 = vld [vmem:[#allocation5 + $0x8] sm:$0xff]  ;;  %v45_v2 = vld [vmem:[#allocation5 + $0x18] sm:$0xff]  ;;  %vm62_vm0 = vcmask 261120   ;;  %v52_v14 = vlaneseq }
  0x27   :  { %130 = vmatprep.mubr.f32.mxu0 %v246_v0  ;;  %v42_v3 = vld [vmem:[#allocation5] sm:$0xff]  ;;  %v156_v4 = vpack.c.bf16 %v45_v2, %v43_v1  ;;  %v44_v5 = vld [vmem:[#allocation5 + $0x10] sm:$0xff]  ;;  %v47_v6 = vld [vmem:[#allocation5 + $0x28] sm:$0xff]  ;;  %s247_s11 = smov [#allocation7]  }
  0x28   :  { %v49_v7 = vld [vmem:[#allocation5 + $0x38] sm:$0xff]  ;;  %v158_v8 = vpack.c.bf16 %v44_v5, %v42_v3  ;;  %v46_v10 = vld [vmem:[#allocation5 + $0x20] sm:$0xff]  ;;  %v48_v11 = vld [vmem:[#allocation5 + $0x30] sm:$0xff]  ;;  %v53_v15 = vshrl.u32 %v52_v14, 7  ;;  %s145_s12 = sshll.u32 %s247_s11, 4  ;;  %s146_s12 = int_to_ptr.vmem [resolvable:$true] %s145_s12 }
  0x29   :  { %v160_v9 = vpack.c.bf16 %v49_v7, %v47_v6  ;;  %157 = vmatprep.subr.bf16.mxu0 %v156_v4  ;;  %v162_v12 = vpack.c.bf16 %v48_v11, %v46_v10  ;;  %v41_v13 = vld [vmem:[#allocation2] sm:$0xff]  ;;  %s214_s13 = scalar_lea.vmem %s146_s12, 256  ;;  %p219_p3 = scmp.lt.s32.totalorder %s146_s12, %s146_s12 }
  0x2a   :  { %159 = vmatpush1.bf16.msra.mxu0 %v158_v8  ;;  %v54_v16 = vsub.s32 0, %v53_v15  ;;  %v50_v17 = vld [vmem:[%s316_s2] sm:$0x3]  ;;  %v58_v18 = vsub.s32 1, %v53_v15  ;;  %p215_p2 = scmp.ne.s32.totalorder %s146_s12, %s214_s13  ;;  %p220_p4 = scmp.lt.s32.totalorder %s214_s13, %s214_s13 }
  0x2b   :  { %161 = vmatprep.subr.bf16.mxu0 %v160_v9 }
  0x2c   :  { %v55_v19 = vrot.slane %v50_v17, %v54_v16  ;;  %v59_v20 = vrot.slane %v50_v17, %v58_v18  ;;  %p221_p5 = por %p220_p4, %p219_p3 }
  0x2e   :  { %163 = vmatpush1.bf16.msra.mxu0 %v162_v12  ;;  %p222_p6 = pnand %p221_p5, %p215_p2 }
  0x31   :  { %155 = vmatmul.mubr.msk.f32.vlgmr.msra.gmra.mrb[0].mxu0 %vm62_vm0, %v41_v13 }
 0x104   :  { %v132_v21 = vpop.f32.mrb[0].mxu0 }
 0x105   :  { %v133_v22 = vadd.f32 %v132_v21, %v55_v19  ;;  %v134_v23 = vpop.f32.mrb[1].mxu0 }
 0x106   :  { %v135_v24 = vadd.f32 %v134_v23, %v59_v20 }
 0x107   :  { %137 = vst [vmem:[#allocation7] sm:$0xff] %v133_v22 }
 0x108   :  { %138 = vst [vmem:[#allocation7 + $0x8] sm:$0xff] %v135_v24 }
 0x109   :  { %225 = shalt.err (!%p222_p6)
}
 0x10a   :  { %s226_s15 = scalar_lea.hbm %s317_s3, 256 }
 0x10b   :  { %p227_p7 = scmp.ne.s32.totalorder %s317_s3, %s226_s15  ;;  %p230_p8 = scmp.lt.u32.totalorder %s226_s15, %s317_s3 }
 0x10d   :  { %p232_p9 = pnand %p230_p8, %p227_p7 }
 0x10f   :  { %235 = shalt.err (!%p232_p9)
}
 0x110   :  { %148 = dma.vmem_to_hbm [thread:$0]  %s146_s12, 256, %s317_s3, [#allocation4]  }
 0x111   :  { %240 = dma.done.wait [#allocation4], 256  }
 0x112   :  { %241 = vsyncadd [#allocation4], 4294967040 }
 0x113   :  { %152 = vsyncpa [#allocation3], 1 }
 0x114   :  { %153 = vsyncpa [#allocation6], 1 }
 0x115   :  { %154 = vsyncpa [#allocation4], 1 }

// kernel: tpu_custom_call.1
= control target key start
LH: loop header
LB: loop body
LE: loop exit
PB: predicated region body
PF: predicated region fallthrough
CT: control target
= control target key end

     0   :  { %8 = vsyncpa [#allocation3], 0  ;;  %s314_s0 = inlined_call_operand.hbm [shape: f32[8,32], index: 0, kind: input, shape index: {}]   ;;  %s315_s1 = inlined_call_operand.hbm [shape: f32[32,256], index: 1, kind: input, shape index: {}]   ;;  %s316_s2 = inlined_call_operand.vmem [shape: f32[1,256], index: 2, kind: input, shape index: {}]   ;;  %s317_s3 = inlined_call_operand.hbm [shape: f32[8,256], index: 3, kind: output, shape index: {}]  }
   0x1   :  { %9 = vsyncpa [#allocation6], 0 }
   0x2   :  { %10 = vsyncpa [#allocation4], 0  ;;  %s242_s12 = smov [#allocation2]   ;;  %s243_s14 = smov [#allocation5]  }
   0x3   :  { %s17_s13 = sshll.u32 %s242_s12, 4  ;;  %s26_s15 = sshll.u32 %s243_s14, 4  ;;  %s18_s13 = int_to_ptr.vmem [resolvable:$true] %s17_s13  ;;  %s268_s15 = int_to_ptr.vmem [resolvable:$true] %s26_s15 }
   0x4   :  { %s170_s18 = scalar_lea.hbm %s314_s0, 128 }
   0x5   :  { %p171_p0 = scmp.ne.s32.totalorder %s314_s0, %s170_s18  ;;  %p174_p1 = scmp.lt.u32.totalorder %s170_s18, %s314_s0 }
   0x7   :  { %p176_p2 = pnand %p174_p1, %p171_p0 }
   0x9   :  { %179 = shalt.err (!%p176_p2)
}
   0xa   :  { %s180_s23 = scalar_lea.vmem %s18_s13, 128  ;;  %p185_p4 = scmp.lt.s32.totalorder %s18_s13, %s18_s13 }
   0xb   :  { %p181_p3 = scmp.ne.s32.totalorder %s18_s13, %s180_s23  ;;  %p186_p5 = scmp.lt.s32.totalorder %s180_s23, %s180_s23 }
   0xd   :  { %p187_p6 = por %p186_p5, %p185_p4 }
   0xf   :  { %p188_p7 = pnand %p187_p6, %p181_p3 }
  0x11   :  { %191 = shalt.err (!%p188_p7)
}
  0x12   :  { %20 = dma.hbm_to_vmem [thread:$0]  %s314_s0, 128, %s18_s13, [#allocation3]  }
  0x13   :  { %s192_s28 = scalar_lea.hbm %s315_s1, 1024 }
  0x14   :  { %p193_p8 = scmp.ne.s32.totalorder %s315_s1, %s192_s28  ;;  %p196_p9 = scmp.lt.u32.totalorder %s192_s28, %s315_s1 }
  0x16   :  { %p198_p10 = pnand %p196_p9, %p193_p8 }
  0x18   :  { %201 = shalt.err (!%p198_p10)
}
  0x19   :  { %s202_s6 = scalar_lea.vmem %s268_s15, 1024  ;;  %p207_p12 = scmp.lt.s32.totalorder %s268_s15, %s268_s15 }
  0x1a   :  { %p203_p11 = scmp.ne.s32.totalorder %s268_s15, %s202_s6  ;;  %p208_p13 = scmp.lt.s32.totalorder %s202_s6, %s202_s6 }
  0x1c   :  { %p209_p0 = por %p208_p13, %p207_p12 }
  0x1e   :  { %p210_p1 = pnand %p209_p0, %p203_p11 }
  0x20   :  { %213 = shalt.err (!%p210_p1)
}
  0x21   :  { %s244_s0 = smov 256   ;;  %s245_s7 = smov 16  }
  0x22   :  { %32 = dma.hbm_to_vmem [thread:$0]  %s315_s1, 1024, %s268_s15, [#allocation6], %s244_s0, %s244_s0, %s245_s7  }
  0x23   :  { %236 = dma.done.wait [#allocation3], 128  }
  0x24   :  { %237 = vsyncadd [#allocation3], 4294967168 }
  0x25   :  { %238 = dma.done.wait [#allocation6], 1024  }
  0x26   :  { %239 = vsyncadd [#allocation6], 4294966272  ;;  %v246_v0 = vmov 0.0   ;;  %v43_v1 = vld [vmem:[#allocation5 + $0x8] sm:$0xff]  ;;  %v45_v2 = vld [vmem:[#allocation5 + $0x18] sm:$0xff]  ;;  %vm62_vm0 = vcmask 261120   ;;  %v52_v14 = vlaneseq }
  0x27   :  { %130 = vmatprep.mubr.f32.mxu0 %v246_v0  ;;  %v42_v3 = vld [vmem:[#allocation5] sm:$0xff]  ;;  %v156_v4 = vpack.c.bf16 %v45_v2, %v43_v1  ;;  %v44_v5 = vld [vmem:[#allocation5 + $0x10] sm:$0xff]  ;;  %v47_v6 = vld [vmem:[#allocation5 + $0x28] sm:$0xff]  ;;  %s247_s11 = smov [#allocation7]  }
  0x28   :  { %v49_v7 = vld [vmem:[#allocation5 + $0x38] sm:$0xff]  ;;  %v158_v8 = vpack.c.bf16 %v44_v5, %v42_v3  ;;  %v46_v10 = vld [vmem:[#allocation5 + $0x20] sm:$0xff]  ;;  %v48_v11 = vld [vmem:[#allocation5 + $0x30] sm:$0xff]  ;;  %v53_v15 = vshrl.u32 %v52_v14, 7  ;;  %s145_s12 = sshll.u32 %s247_s11, 4  ;;  %s146_s12 = int_to_ptr.vmem [resolvable:$true] %s145_s12 }
  0x29   :  { %v160_v9 = vpack.c.bf16 %v49_v7, %v47_v6  ;;  %157 = vmatprep.subr.bf16.mxu0 %v156_v4  ;;  %v162_v12 = vpack.c.bf16 %v48_v11, %v46_v10  ;;  %v41_v13 = vld [vmem:[#allocation2] sm:$0xff]  ;;  %s214_s13 = scalar_lea.vmem %s146_s12, 256  ;;  %p219_p3 = scmp.lt.s32.totalorder %s146_s12, %s146_s12 }
  0x2a   :  { %159 = vmatpush1.bf16.msra.mxu0 %v158_v8  ;;  %v54_v16 = vsub.s32 0, %v53_v15  ;;  %v50_v17 = vld [vmem:[%s316_s2] sm:$0x3]  ;;  %v58_v18 = vsub.s32 1, %v53_v15  ;;  %p215_p2 = scmp.ne.s32.totalorder %s146_s12, %s214_s13  ;;  %p220_p4 = scmp.lt.s32.totalorder %s214_s13, %s214_s13 }
  0x2b   :  { %161 = vmatprep.subr.bf16.mxu0 %v160_v9 }
  0x2c   :  { %v55_v19 = vrot.slane %v50_v17, %v54_v16  ;;  %v59_v20 = vrot.slane %v50_v17, %v58_v18  ;;  %p221_p5 = por %p220_p4, %p219_p3 }
  0x2e   :  { %163 = vmatpush1.bf16.msra.mxu0 %v162_v12  ;;  %p222_p6 = pnand %p221_p5, %p215_p2 }
  0x31   :  { %155 = vmatmul.mubr.msk.f32.vlgmr.msra.gmra.mrb[0].mxu0 %vm62_vm0, %v41_v13 }
 0x104   :  { %v132_v21 = vpop.f32.mrb[0].mxu0 }
 0x105   :  { %v133_v22 = vadd.f32 %v132_v21, %v55_v19  ;;  %v134_v23 = vpop.f32.mrb[1].mxu0 }
 0x106   :  { %v135_v24 = vadd.f32 %v134_v23, %v59_v20 }
 0x107   :  { %137 = vst [vmem:[#allocation7] sm:$0xff] %v133_v22 }
 0x108   :  { %138 = vst [vmem:[#allocation7 + $0x8] sm:$0xff] %v135_v24 }
 0x109   :  { %225 = shalt.err (!%p222_p6)
}
 0x10a   :  { %s226_s15 = scalar_lea.hbm %s317_s3, 256 }
 0x10b   :  { %p227_p7 = scmp.ne.s32.totalorder %s317_s3, %s226_s15  ;;  %p230_p8 = scmp.lt.u32.totalorder %s226_s15, %s317_s3 }
 0x10d   :  { %p232_p9 = pnand %p230_p8, %p227_p7 }
 0x10f   :  { %235 = shalt.err (!%p232_p9)
}
 0x110   :  { %148 = dma.vmem_to_hbm [thread:$0]  %s146_s12, 256, %s317_s3, [#allocation4]  }
 0x111   :  { %240 = dma.done.wait [#allocation4], 256  }
 0x112   :  { %241 = vsyncadd [#allocation4], 4294967040 }
 0x113   :  { %152 = vsyncpa [#allocation3], 1 }
 0x114   :  { %153 = vsyncpa [#allocation6], 1 }
 0x115   :  { %154 = vsyncpa [#allocation4], 1 }

</bundles_post_ra>
